<compile_context>
chip_gen: v7x
topology: tpu7x:2x2x1
jax: 0.10.0
libtpu: 0.0.40
codegen_flags: <defaults>
</compile_context>

<pallas_src>
import functools

import jax
import jax.numpy as jnp
from jax import lax
from jax.experimental import pallas as pl
from jax.experimental.pallas import tpu as pltpu


def _round_up(x, m):
    return ((x + m - 1) // m) * m


# ---------------------------------------------------------------------------
# Kernel
# ---------------------------------------------------------------------------
def fc_q_kernel(state_ref, w1_ref, w2_ref, w3_ref, b_ref, out_ref, *, num_actions):
    """One batch tile of the fused FC_Q forward.

    state_ref : [TB, S]          f32
    w1_ref    : [S,   H2P]       f32/bf16  (= [q1.W | i1.W | 0])
    w2_ref    : [H2P, H2P]       f32/bf16  (= blockdiag(q2.W, i2.W), zero-padded)
    w3_ref    : [H2P, OUT_W]     f32/bf16  (cols = [q3.W | i3.W | i3.W | 0])
    b_ref     : [3,   BW]        f32       (row0=b1, row1=b2, row2=b3, zero-padded)
    out_ref   : [TB,  OUT_W]     f32       cols [0:A)=q3(q), [A:2A)=relu(i3(i)),
                                           [2A:3A)=log_softmax(i), rest zero.
    """
    a = num_actions
    h2p = w1_ref.shape[1]           # padded 2*hidden_dim
    out_w = w3_ref.shape[1]         # padded output width (>= 3A, multiple of 128)
    cdt = w1_ref.dtype              # MXU operand dtype (f32 or bf16)

    s = state_ref[...]
    b1 = b_ref[0:1, 0:h2p]          # 128-aligned prefix slices of full rows
    b2 = b_ref[1:2, 0:h2p]
    b3 = b_ref[2:3, 0:out_w]

    # Layer 1 (fused q1 & i1): [TB, S] @ [S, H2P]
    h = jnp.dot(s.astype(cdt), w1_ref[...], preferred_element_type=jnp.float32) + b1
    h = jnp.maximum(h, 0.0)
    # Layer 2 (block-diag q2 & i2): [TB, H2P] @ [H2P, H2P]
    h = jnp.dot(h.astype(cdt), w2_ref[...], preferred_element_type=jnp.float32) + b2
    h = jnp.maximum(h, 0.0)
    # Layer 3 (block-diag q3 & i3, i3 duplicated): [TB, H2P] @ [H2P, OUT_W]
    # z cols: [0:a)=q3(q) pre-activation, [a:2a)=i3(i) pre-relu,
    #         [2a:3a)=i3(i) pre-relu (copy), [3a:) = 0.
    z = jnp.dot(h.astype(cdt), w3_ref[...], preferred_element_type=jnp.float32) + b3

    col = lax.broadcasted_iota(jnp.int32, z.shape, 1)
    # ReLU everywhere except the q block (q3 output has no activation);
    # the zero-padded tail stays exactly zero.
    r = jnp.where(col < a, z, jnp.maximum(z, 0.0))

    # Numerically-stable log_softmax over the duplicated i block [2a:3a),
    # computed in place with full-width masked reductions (exp/log -> EUP).
    in_ls = jnp.logical_and(col >= 2 * a, col < 3 * a)
    masked = jnp.where(in_ls, r, -jnp.inf)
    m = jnp.max(masked, axis=-1, keepdims=True)
    lse = m + jnp.log(jnp.sum(jnp.exp(masked - m), axis=-1, keepdims=True))

    # Single lane-dense, unmasked full-tile store.
    out_ref[...] = jnp.where(in_ls, r - lse, r).astype(out_ref.dtype)


# ---------------------------------------------------------------------------
# Parameter packing (done once, outside the kernel)
# ---------------------------------------------------------------------------
def pack_params(params, compute_dtype=jnp.float32):
    """Fuse the 12 per-layer tensors into 3 lane-dense weights + 1 bias block.

    compute_dtype: dtype of the MXU operands.  Use jnp.bfloat16 on v6e/v7x
    (bf16-native MXU); accumulation stays f32 inside the kernel.
    """
    S, H = params["q1w"].shape
    A = params["q3w"].shape[1]
    h2 = 2 * H
    h2p = _round_up(h2, 128)          # padded hidden width
    out_w = _round_up(3 * A, 128)     # padded output width
    bw = max(h2p, out_w)              # packed-bias lane width
    f32 = jnp.float32
    zeros = lambda r, c: jnp.zeros((r, c), f32)

    # Layer 1: [S, h2p] = [q1 | i1 | 0]
    w1 = jnp.concatenate([params["q1w"], params["i1w"], zeros(S, h2p - h2)], axis=1)

    # Layer 2: blockdiag(q2, i2), zero-padded to [h2p, h2p]
    top = jnp.concatenate([params["q2w"], zeros(H, H)], axis=1)
    bot = jnp.concatenate([zeros(H, H), params["i2w"]], axis=1)
    w2 = jnp.concatenate([top, bot], axis=0)
    w2 = jnp.pad(w2, ((0, h2p - h2), (0, h2p - h2)))

    # Layer 3: [h2p, out_w], columns = [q3 | i3 | i3 (dup, feeds log_softmax) | 0]
    col_q = jnp.concatenate([params["q3w"], zeros(H, A)], axis=0)   # [2H, A]
    col_i = jnp.concatenate([zeros(H, A), params["i3w"]], axis=0)   # [2H, A]
    w3 = jnp.concatenate([col_q, col_i, col_i], axis=1)             # [2H, 3A]
    w3 = jnp.pad(w3, ((0, h2p - h2), (0, out_w - 3 * A)))

    # Biases: one [3, bw] array, one zero-padded full row per layer.
    b1 = jnp.concatenate([params["q1b"], params["i1b"]], axis=1)
    b2 = jnp.concatenate([params["q2b"], params["i2b"]], axis=1)
    b3 = jnp.concatenate([params["q3b"], params["i3b"], params["i3b"]], axis=1)
    bias = jnp.concatenate([
        jnp.pad(b1, ((0, 0), (0, bw - h2))),
        jnp.pad(b2, ((0, 0), (0, bw - h2))),
        jnp.pad(b3, ((0, 0), (0, bw - 3 * A))),
    ], axis=0)

    return {
        "W1": w1.astype(compute_dtype),
        "W2": w2.astype(compute_dtype),
        "W3": w3.astype(compute_dtype),
        "b": bias.astype(jnp.float32),
        "num_actions": A,
    }


# ---------------------------------------------------------------------------
# Wrapper
# ---------------------------------------------------------------------------
def fc_q_forward(state, packed, *, batch_tile=256):
    """state: [B, state_dim] f32; packed: output of pack_params()."""
    B, S = state.shape
    a = packed["num_actions"]
    out_w = packed["W3"].shape[1]

    # Batch tiling: TB multiple of 8 (sublanes); pad B up to a multiple of TB.
    tb = min(_round_up(batch_tile, 8), _round_up(B, 8))
    b_pad = _round_up(B, tb)
    if b_pad != B:
        state = jnp.pad(state, ((0, b_pad - B), (0, 0)))
    grid = (b_pad // tb,)

    kernel = functools.partial(fc_q_kernel, num_actions=a)

    out = pl.pallas_call(
        kernel,
        out_shape=jax.ShapeDtypeStruct((b_pad, out_w), jnp.float32),
        grid_spec=pltpu.PrefetchScalarGridSpec(
            num_scalar_prefetch=0,
            grid=grid,
            in_specs=[
                pl.BlockSpec((tb, S), lambda b: (b, 0)),
                # Weights/bias: constant index_map -> fetched once and kept
                # VMEM-resident across all batch tiles.
                pl.BlockSpec(packed["W1"].shape, lambda b: (0, 0)),
                pl.BlockSpec(packed["W2"].shape, lambda b: (0, 0)),
                pl.BlockSpec(packed["W3"].shape, lambda b: (0, 0)),
                pl.BlockSpec(packed["b"].shape, lambda b: (0, 0)),
            ],
            out_specs=pl.BlockSpec((tb, out_w), lambda b: (b, 0)),
        ),
        compiler_params=pltpu.CompilerParams(
            # Batch tiles are independent -> shard across v7x's 2 TensorCores.
            # VMEM: resident weights (<~2 MiB f32 even at hidden_dim=256) plus
            # double-buffered (tb,S)/(tb,out_w) tiles stays far below the
            # scoped default on every generation.
            dimension_semantics=("parallel",),
        ),
    )(state, packed["W1"], packed["W2"], packed["W3"], packed["b"])

    # Kernel output layout: [q | i | log_softmax(i) | pad]
    q_out = out[:B, 0:a]
    i_out = out[:B, a:2 * a]
    logp = out[:B, 2 * a:3 * a]
    return q_out, logp, i_out


# ---------------------------------------------------------------------------
# Init + pure-JAX reference
# ---------------------------------------------------------------------------
def init_params(key, state_dim, num_actions, hidden_dim):
    """Deterministic synthetic init (PyTorch-Linear-like uniform fan-in).
    Weights stored as [in, out] (transpose of nn.Linear.weight); bias [1, out]."""
    def linear(k, fan_in, fan_out):
        kw, kb = jax.random.split(k)
        bound = 1.0 / jnp.sqrt(fan_in)
        w = jax.random.uniform(kw, (fan_in, fan_out), jnp.float32, -bound, bound)
        b = jax.random.uniform(kb, (1, fan_out), jnp.float32, -bound, bound)
        return w, b

    keys = jax.random.split(key, 6)
    p = {}
    p["q1w"], p["q1b"] = linear(keys[0], state_dim, hidden_dim)
    p["q2w"], p["q2b"] = linear(keys[1], hidden_dim, hidden_dim)
    p["q3w"], p["q3b"] = linear(keys[2], hidden_dim, num_actions)
    p["i1w"], p["i1b"] = linear(keys[3], state_dim, hidden_dim)
    p["i2w"], p["i2b"] = linear(keys[4], hidden_dim, hidden_dim)
    p["i3w"], p["i3b"] = linear(keys[5], hidden_dim, num_actions)
    return p


def fc_q_reference(state, p):
    """Pure-JAX reference mirroring the PyTorch forward."""
    q = jax.nn.relu(state @ p["q1w"] + p["q1b"])
    q = jax.nn.relu(q @ p["q2w"] + p["q2b"])
    q_out = q @ p["q3w"] + p["q3b"]
    i = jax.nn.relu(state @ p["i1w"] + p["i1b"])
    i = jax.nn.relu(i @ p["i2w"] + p["i2b"])
    i = jax.nn.relu(i @ p["i3w"] + p["i3b"])
    return q_out, jax.nn.log_softmax(i, axis=1), i


if __name__ == "__main__":
    B, STATE_DIM, NUM_ACTIONS, HIDDEN = 8, 16, 4, 32

    key = jax.random.PRNGKey(0)
    k_params, k_state = jax.random.split(key)
    params = init_params(k_params, STATE_DIM, NUM_ACTIONS, HIDDEN)
    state = jax.random.normal(k_state, (B, STATE_DIM), jnp.float32)

    q_ref, logp_ref, i_ref = fc_q_reference(state, params)

    # f32 MXU operands: tight match with the reference.
    packed_f32 = pack_params(params, jnp.float32)
    q_out, logp, i_out = jax.block_until_ready(fc_q_forward(state, packed_f32))
    assert jnp.allclose(q_out, q_ref, atol=1e-4, rtol=1e-4)
    assert jnp.allclose(logp, logp_ref, atol=1e-4, rtol=1e-4)
    assert jnp.allclose(i_out, i_ref, atol=1e-4, rtol=1e-4)

    # bf16 MXU operands (v6e/v7x-native path), f32 accumulation + f32 epilogue.
    packed_bf16 = pack_params(params, jnp.bfloat16)
    q_b, logp_b, i_b = jax.block_until_ready(fc_q_forward(state, packed_bf16))
    assert jnp.allclose(q_b, q_ref, atol=5e-2, rtol=5e-2)
    assert jnp.allclose(logp_b, logp_ref, atol=5e-2, rtol=5e-2)
    assert jnp.allclose(i_b, i_ref, atol=5e-2, rtol=5e-2)

    print("KERNEL_OK")
</pallas_src>

<mosaic_0001>
module attributes {stable_mosaic.version = 11 : i64} {
  func.func @fc_q_kernel(%arg0: i32, %arg1: memref<8x16xf32, #tpu.memory_space<vmem>>, %arg2: memref<16x128xf32, #tpu.memory_space<vmem>>, %arg3: memref<128x128xf32, #tpu.memory_space<vmem>>, %arg4: memref<128x128xf32, #tpu.memory_space<vmem>>, %arg5: memref<3x128xf32, #tpu.memory_space<vmem>>, %arg6: memref<8x128xf32, #tpu.memory_space<vmem>>) attributes {dimension_semantics = [#tpu.dimension_semantics<parallel>], iteration_bounds = array<i64: 1>, scalar_prefetch = 0 : i64, scratch_operands = 0 : i64, tpu.core_type = #tpu.core_type<tc>, window_params = [{transform_indices = @transform_0, window_bounds = array<i64: 8, 16>}, {pipeline_mode = #tpu.pipeline_mode<synchronous>, transform_indices = @transform_1, window_bounds = array<i64: 16, 128>}, {pipeline_mode = #tpu.pipeline_mode<synchronous>, transform_indices = @transform_2, window_bounds = array<i64: 128, 128>}, {pipeline_mode = #tpu.pipeline_mode<synchronous>, transform_indices = @transform_3, window_bounds = array<i64: 128, 128>}, {pipeline_mode = #tpu.pipeline_mode<synchronous>, transform_indices = @transform_4, window_bounds = array<i64: 3, 128>}, {transform_indices = @transform_5, window_bounds = array<i64: 8, 128>}]} {
    %c0 = arith.constant 0 : index
    %c0_0 = arith.constant 0 : index
    %0 = vector.load %arg1[%c0, %c0_0] : memref<8x16xf32, #tpu.memory_space<vmem>>, vector<8x16xf32>
    %c0_1 = arith.constant 0 : index
    %c0_2 = arith.constant 0 : index
    %1 = vector.load %arg5[%c0_1, %c0_2] : memref<3x128xf32, #tpu.memory_space<vmem>>, vector<1x128xf32>
    %c1 = arith.constant 1 : index
    %c0_3 = arith.constant 0 : index
    %2 = vector.load %arg5[%c1, %c0_3] : memref<3x128xf32, #tpu.memory_space<vmem>>, vector<1x128xf32>
    %c2 = arith.constant 2 : index
    %c0_4 = arith.constant 0 : index
    %3 = vector.load %arg5[%c2, %c0_4] : memref<3x128xf32, #tpu.memory_space<vmem>>, vector<1x128xf32>
    %c0_5 = arith.constant 0 : index
    %c0_6 = arith.constant 0 : index
    %4 = vector.load %arg2[%c0_5, %c0_6] : memref<16x128xf32, #tpu.memory_space<vmem>>, vector<16x128xf32>
    %cst = arith.constant dense<0.000000e+00> : vector<8x128xf32>
    %5 = tpu.matmul %0, %4, %cst {dimension_numbers = #tpu.dot_dimension_numbers<[1], [0], [0], [1], [0, 0, 1, 1], [], []>} : vector<8x16xf32>, vector<16x128xf32>, vector<8x128xf32> -> vector<8x128xf32>
    %6 = vector.broadcast %1 : vector<1x128xf32> to vector<8x128xf32>
    %7 = arith.addf %5, %6 : vector<8x128xf32>
    %cst_7 = arith.constant 0.000000e+00 : f32
    %8 = vector.broadcast %cst_7 : f32 to vector<8x128xf32>
    %9 = arith.maximumf %7, %8 : vector<8x128xf32>
    %c0_8 = arith.constant 0 : index
    %c0_9 = arith.constant 0 : index
    %10 = vector.load %arg3[%c0_8, %c0_9] : memref<128x128xf32, #tpu.memory_space<vmem>>, vector<128x128xf32>
    %cst_10 = arith.constant dense<0.000000e+00> : vector<8x128xf32>
    %11 = tpu.matmul %9, %10, %cst_10 {dimension_numbers = #tpu.dot_dimension_numbers<[1], [0], [0], [1], [0, 0, 1, 1], [], []>} : vector<8x128xf32>, vector<128x128xf32>, vector<8x128xf32> -> vector<8x128xf32>
    %12 = vector.broadcast %2 : vector<1x128xf32> to vector<8x128xf32>
    %13 = arith.addf %11, %12 : vector<8x128xf32>
    %cst_11 = arith.constant 0.000000e+00 : f32
    %14 = vector.broadcast %cst_11 : f32 to vector<8x128xf32>
    %15 = arith.maximumf %13, %14 : vector<8x128xf32>
    %c0_12 = arith.constant 0 : index
    %c0_13 = arith.constant 0 : index
    %16 = vector.load %arg4[%c0_12, %c0_13] : memref<128x128xf32, #tpu.memory_space<vmem>>, vector<128x128xf32>
    %cst_14 = arith.constant dense<0.000000e+00> : vector<8x128xf32>
    %17 = tpu.matmul %15, %16, %cst_14 {dimension_numbers = #tpu.dot_dimension_numbers<[1], [0], [0], [1], [0, 0, 1, 1], [], []>} : vector<8x128xf32>, vector<128x128xf32>, vector<8x128xf32> -> vector<8x128xf32>
    %18 = vector.broadcast %3 : vector<1x128xf32> to vector<8x128xf32>
    %19 = arith.addf %17, %18 : vector<8x128xf32>
    %20 = tpu.iota {dimensions = array<i32: 1>} : vector<8x128xi32>
    %c4_i32 = arith.constant 4 : i32
    %21 = vector.broadcast %c4_i32 : i32 to vector<8x128xi32>
    %22 = arith.cmpi slt, %20, %21 : vector<8x128xi32>
    %cst_15 = arith.constant 0.000000e+00 : f32
    %23 = vector.broadcast %cst_15 : f32 to vector<8x128xf32>
    %24 = arith.maximumf %19, %23 : vector<8x128xf32>
    %25 = arith.select %22, %19, %24 : vector<8x128xi1>, vector<8x128xf32>
    %c8_i32 = arith.constant 8 : i32
    %26 = vector.broadcast %c8_i32 : i32 to vector<8x128xi32>
    %27 = arith.cmpi sge, %20, %26 : vector<8x128xi32>
    %c12_i32 = arith.constant 12 : i32
    %28 = vector.broadcast %c12_i32 : i32 to vector<8x128xi32>
    %29 = arith.cmpi slt, %20, %28 : vector<8x128xi32>
    %30 = arith.andi %27, %29 : vector<8x128xi1>
    %cst_16 = arith.constant 0xFF800000 : f32
    %31 = vector.broadcast %cst_16 : f32 to vector<8x128xf32>
    %32 = arith.select %30, %25, %31 : vector<8x128xi1>, vector<8x128xf32>
    %cst_17 = arith.constant dense<0xFF800000> : vector<8xf32>
    %33 = vector.multi_reduction <maximumf>, %32, %cst_17 [1] : vector<8x128xf32> to vector<8xf32>
    %34 = vector.shape_cast %33 : vector<8xf32> to vector<8x1xf32>
    %35 = vector.broadcast %34 : vector<8x1xf32> to vector<8x128xf32>
    %36 = arith.subf %32, %35 : vector<8x128xf32>
    %37 = math.exp %36 : vector<8x128xf32>
    %cst_18 = arith.constant dense<0.000000e+00> : vector<8xf32>
    %38 = vector.multi_reduction <add>, %37, %cst_18 [1] : vector<8x128xf32> to vector<8xf32>
    %39 = vector.shape_cast %38 : vector<8xf32> to vector<8x1xf32>
    %40 = math.log %39 : vector<8x1xf32>
    %41 = arith.addf %34, %40 : vector<8x1xf32>
    %42 = vector.broadcast %41 : vector<8x1xf32> to vector<8x128xf32>
    %43 = arith.subf %25, %42 : vector<8x128xf32>
    %44 = arith.select %30, %43, %25 : vector<8x128xi1>, vector<8x128xf32>
    %c0_19 = arith.constant 0 : index
    %c0_20 = arith.constant 0 : index
    %45 = vector.load %arg6[%c0_19, %c0_20] : memref<8x128xf32, #tpu.memory_space<vmem>>, vector<8x128xf32>
    tpu.vector_store %arg6[%c0_19, %c0_20], %44 {strides = array<i32>} : memref<8x128xf32, #tpu.memory_space<vmem>>, vector<8x128xf32>,
    return
  }
  func.func @transform_0(%arg0: i32) -> (i32, i32) {
    %c0_i32 = arith.constant 0 : i32
    %c0_i32_0 = arith.constant 0 : i32
    return %arg0, %c0_i32 : i32, i32
  }
  func.func @transform_1(%arg0: i32) -> (i32, i32) {
    %c0_i32 = arith.constant 0 : i32
    %c0_i32_0 = arith.constant 0 : i32
    %c0_i32_1 = arith.constant 0 : i32
    return %c0_i32, %c0_i32_0 : i32, i32
  }
  func.func @transform_2(%arg0: i32) -> (i32, i32) {
    %c0_i32 = arith.constant 0 : i32
    %c0_i32_0 = arith.constant 0 : i32
    %c0_i32_1 = arith.constant 0 : i32
    return %c0_i32, %c0_i32_0 : i32, i32
  }
  func.func @transform_3(%arg0: i32) -> (i32, i32) {
    %c0_i32 = arith.constant 0 : i32
    %c0_i32_0 = arith.constant 0 : i32
    %c0_i32_1 = arith.constant 0 : i32
    return %c0_i32, %c0_i32_0 : i32, i32
  }
  func.func @transform_4(%arg0: i32) -> (i32, i32) {
    %c0_i32 = arith.constant 0 : i32
    %c0_i32_0 = arith.constant 0 : i32
    %c0_i32_1 = arith.constant 0 : i32
    return %c0_i32, %c0_i32_0 : i32, i32
  }
  func.func @transform_5(%arg0: i32) -> (i32, i32) {
    %c0_i32 = arith.constant 0 : i32
    %c0_i32_0 = arith.constant 0 : i32
    return %arg0, %c0_i32 : i32, i32
  }
}

</mosaic_0001>

<bundles_post_ra>
// kernel: tpu_custom_call.1
= control target key start
LH: loop header
LB: loop body
LE: loop exit
PB: predicated region body
PF: predicated region fallthrough
CT: control target
= control target key end

     0   :  { %10 = vsyncpa [#allocation3], 0  ;;  %s826_s0 = inlined_call_operand.hbm [shape: f32[8,16], index: 0, kind: input, shape index: {}]   ;;  %s827_s1 = inlined_call_operand.hbm [shape: f32[16,128], index: 1, kind: input, shape index: {}]   ;;  %s828_s2 = inlined_call_operand.hbm [shape: f32[128,128], index: 2, kind: input, shape index: {}]   ;;  %s829_s3 = inlined_call_operand.hbm [shape: f32[128,128], index: 3, kind: input, shape index: {}]   ;;  %s830_s4 = inlined_call_operand.vmem [shape: f32[3,128], index: 4, kind: input, shape index: {}]   ;;  %s831_s5 = inlined_call_operand.hbm [shape: f32[8,128], index: 5, kind: output, shape index: {}]  }
   0x1   :  { %11 = vsyncpa [#allocation6], 0 }
   0x2   :  { %12 = vsyncpa [#allocation9], 0 }
   0x3   :  { %13 = vsyncpa [#allocation4], 0  ;;  %s680_s18 = smov [#allocation5]   ;;  %s562_s22 = scalar_lea.hbm %s827_s1, 256 }
   0x4   :  { %s29_s19 = sshll.u32 %s680_s18, 4  ;;  %p563_p0 = scmp.ne.s32.totalorder %s827_s1, %s562_s22  ;;  %s30_s19 = int_to_ptr.vmem [resolvable:$true] %s29_s19 }
   0x5   :  { %p566_p1 = scmp.lt.u32.totalorder %s562_s22, %s827_s1 }
   0x7   :  { %p568_p2 = pnand %p566_p1, %p563_p0 }
   0x9   :  { %571 = shalt.err (!%p568_p2)
}
   0xa   :  { %s572_s27 = scalar_lea.vmem %s30_s19, 256  ;;  %p577_p4 = scmp.lt.s32.totalorder %s30_s19, %s30_s19 }
   0xb   :  { %p573_p3 = scmp.ne.s32.totalorder %s30_s19, %s572_s27  ;;  %p578_p5 = scmp.lt.s32.totalorder %s572_s27, %s572_s27 }
   0xd   :  { %p579_p6 = por %p578_p5, %p577_p4 }
   0xf   :  { %p580_p7 = pnand %p579_p6, %p573_p3 }
  0x11   :  { %583 = shalt.err (!%p580_p7)
}
  0x12   :  { %s681_s28 = smov 128   ;;  %s682_s29 = smov 8  }
  0x13   :  { %35 = dma.hbm_to_vmem [thread:$0]  %s827_s1, 256, %s30_s19, [#allocation6], %s681_s28, %s681_s28, %s682_s29  }
  0x14   :  { %s683_s7 = smov [#allocation2]   ;;  %s684_s9 = smov [#allocation7]  }
  0x15   :  { %s20_s8 = sshll.u32 %s683_s7, 4  ;;  %s41_s10 = sshll.u32 %s684_s9, 4  ;;  %s21_s8 = int_to_ptr.vmem [resolvable:$true] %s20_s8  ;;  %s42_s10 = int_to_ptr.vmem [resolvable:$true] %s41_s10 }
  0x16   :  { %s584_s13 = scalar_lea.hbm %s826_s0, 128 }
  0x17   :  { %p585_p8 = scmp.ne.s32.totalorder %s826_s0, %s584_s13  ;;  %p588_p9 = scmp.lt.u32.totalorder %s584_s13, %s826_s0 }
  0x19   :  { %p590_p10 = pnand %p588_p9, %p585_p8 }
  0x1b   :  { %593 = shalt.err (!%p590_p10)
}
  0x1c   :  { %s594_s1 = scalar_lea.vmem %s21_s8, 128  ;;  %p599_p12 = scmp.lt.s32.totalorder %s21_s8, %s21_s8 }
  0x1d   :  { %p595_p11 = scmp.ne.s32.totalorder %s21_s8, %s594_s1  ;;  %p600_p13 = scmp.lt.s32.totalorder %s594_s1, %s594_s1 }
  0x1f   :  { %p601_p0 = por %p600_p13, %p599_p12 }
  0x21   :  { %p602_p1 = pnand %p601_p0, %p595_p11 }
  0x23   :  { %605 = shalt.err (!%p602_p1)
}
  0x24   :  { %23 = dma.hbm_to_vmem [thread:$0]  %s826_s0, 128, %s21_s8, [#allocation3]  }
  0x25   :  { %s606_s22 = scalar_lea.hbm %s828_s2, 2048 }
  0x26   :  { %p607_p2 = scmp.ne.s32.totalorder %s828_s2, %s606_s22  ;;  %p610_p3 = scmp.lt.u32.totalorder %s606_s22, %s828_s2 }
  0x28   :  { %p612_p4 = pnand %p610_p3, %p607_p2 }
  0x2a   :  { %615 = shalt.err (!%p612_p4)
}
  0x2b   :  { %s616_s27 = scalar_lea.vmem %s42_s10, 2048  ;;  %p621_p6 = scmp.lt.s32.totalorder %s42_s10, %s42_s10 }
  0x2c   :  { %p617_p5 = scmp.ne.s32.totalorder %s42_s10, %s616_s27  ;;  %p622_p7 = scmp.lt.s32.totalorder %s616_s27, %s616_s27 }
  0x2e   :  { %p623_p8 = por %p622_p7, %p621_p6 }
  0x30   :  { %p624_p9 = pnand %p623_p8, %p617_p5 }
  0x32   :  { %627 = shalt.err (!%p624_p9)
}
  0x33   :  { %47 = dma.hbm_to_vmem [thread:$0]  %s828_s2, 2048, %s42_s10, [#allocation6], %s681_s28, %s681_s28, %s682_s29  }
  0x34   :  { %s685_s6 = smov [#allocation8]   ;;  %s628_s11 = scalar_lea.hbm %s829_s3, 2048 }
  0x35   :  { %s53_s7 = sshll.u32 %s685_s6, 4  ;;  %p629_p10 = scmp.ne.s32.totalorder %s829_s3, %s628_s11  ;;  %s54_s7 = int_to_ptr.vmem [resolvable:$true] %s53_s7 }
  0x36   :  { %p632_p11 = scmp.lt.u32.totalorder %s628_s11, %s829_s3 }
  0x38   :  { %p634_p12 = pnand %p632_p11, %p629_p10 }
  0x3a   :  { %637 = shalt.err (!%p634_p12)
}
  0x3b   :  { %s638_s16 = scalar_lea.vmem %s54_s7, 2048  ;;  %p643_p0 = scmp.lt.s32.totalorder %s54_s7, %s54_s7 }
  0x3c   :  { %p639_p13 = scmp.ne.s32.totalorder %s54_s7, %s638_s16  ;;  %p644_p1 = scmp.lt.s32.totalorder %s638_s16, %s638_s16 }
  0x3e   :  { %p645_p2 = por %p644_p1, %p643_p0 }
  0x40   :  { %p646_p3 = pnand %p645_p2, %p639_p13 }
  0x42   :  { %649 = shalt.err (!%p646_p3)
}
  0x43   :  { %59 = dma.hbm_to_vmem [thread:$0]  %s829_s3, 2048, %s54_s7, [#allocation9], %s681_s28, %s681_s28, %s682_s29  }
  0x44   :  { %672 = dma.done.wait [#allocation3], 128  }
  0x45   :  { %673 = vsyncadd [#allocation3], 4294967168 }
  0x46   :  { %674 = dma.done.wait [#allocation6], 2304  }
  0x47   :  { %675 = vsyncadd [#allocation6], 4294964992 }
  0x48   :  { %676 = dma.done.wait [#allocation9], 2048  }
  0x49   :  { %677 = vsyncadd [#allocation9], 4294965248  ;;  %v686_v0 = vmov 0.0|0.0   ;;  %vm687_vm0 = vmmov 0   ;;  %v688_v1 = vmov 0.0   ;;  %v78_v2 = vld [vmem:[#allocation5] sm:$0xff] }
  0x4a   :  { %497 = vmatprep.subr.bf16.mxu0 %v686_v0  ;;  %424 = vmatprep.mubr.msk.f32.mxu0 %vm687_vm0, %v688_v1  ;;  %v79_v3 = vld [vmem:[#allocation5 + $0x8] sm:$0xff]  ;;  %v159_v5 = vld [vmem:[#allocation7] sm:$0xff]  ;;  %v160_v6 = vld [vmem:[#allocation7 + $0x8] sm:$0xff]  ;;  %vm84_vm1 = vcmask 130048  }
  0x4b   :  { %500 = vmatprep.subr.bf16.mxu1 %v686_v0  ;;  %459 = vmatprep.mubr.msk.f32.mxu1 %vm687_vm0, %v688_v1  ;;  %v498_v4 = vpack.c.bf16 %v79_v3, %v78_v2  ;;  %v161_v7 = vld [vmem:[#allocation7 + $0x10] sm:$0xff]  ;;  %v501_v8 = vpack.c.bf16 %v160_v6, %v159_v5  ;;  %v162_v9 = vld [vmem:[#allocation7 + $0x18] sm:$0xff]  ;;  %v74_v10 = vld [vmem:[#allocation2] sm:$0xff] }
  0x4c   :  { %v504_v11 = vpack.c.bf16 %v162_v9, %v161_v7  ;;  %v163_v12 = vld [vmem:[#allocation7 + $0x20] sm:$0xff]  ;;  %v164_v13 = vld [vmem:[#allocation7 + $0x28] sm:$0xff]  ;;  %v165_v15 = vld [vmem:[#allocation7 + $0x30] sm:$0xff] }
  0x4d   :  { %499 = vmatpush3.bf16.msra.mxu0 %v498_v4  ;;  %502 = vmatpush3.bf16.msra.mxu1 %v501_v8  ;;  %v507_v14 = vpack.c.bf16 %v164_v13, %v163_v12  ;;  %v166_v16 = vld [vmem:[#allocation7 + $0x38] sm:$0xff]  ;;  %v167_v18 = vld [vmem:[#allocation7 + $0x40] sm:$0xff]  ;;  %v168_v19 = vld [vmem:[#allocation7 + $0x48] sm:$0xff] }
  0x4e   :  { %524 = vmatprep.subr.bf16.mxu0 %v686_v0  ;;  %503 = vmatprep.subr.bf16.mxu1 %v686_v0  ;;  %v510_v17 = vpack.c.bf16 %v166_v16, %v165_v15  ;;  %v513_v20 = vpack.c.bf16 %v168_v19, %v167_v18  ;;  %v169_v21 = vld [vmem:[#allocation7 + $0x50] sm:$0xff]  ;;  %v170_v22 = vld [vmem:[#allocation7 + $0x58] sm:$0xff]  ;;  %v171_v24 = vld [vmem:[#allocation7 + $0x60] sm:$0xff] }
  0x4f   :  { %v516_v23 = vpack.c.bf16 %v170_v22, %v169_v21  ;;  %v172_v25 = vld [vmem:[#allocation7 + $0x68] sm:$0xff]  ;;  %v173_v27 = vld [vmem:[#allocation7 + $0x70] sm:$0xff]  ;;  %v174_v28 = vld [vmem:[#allocation7 + $0x78] sm:$0xff] }
  0x50   :  { %425 = vmatmul.mubr.msk.f32.vlgmr.msra.gmra.mrb[0].mxu0 %vm84_vm1, %v74_v10  ;;  %v519_v26 = vpack.c.bf16 %v172_v25, %v171_v24  ;;  %v522_v29 = vpack.c.bf16 %v174_v28, %v173_v27  ;;  %v250_v30 = vld [vmem:[#allocation8] sm:$0xff]  ;;  %v251_v31 = vld [vmem:[#allocation8 + $0x8] sm:$0xff]  ;;  %v252_v32 = vld [vmem:[#allocation8 + $0x10] sm:$0xff] }
  0x51   :  { %494 = vmatprep.mubr.msk.f32.mxu0 %vm687_vm0, %v688_v1  ;;  %505 = vmatpush3.bf16.msra.mxu1 %v504_v11  ;;  %v525_v33 = vpack.c.bf16 %v251_v31, %v250_v30  ;;  %v253_v34 = vld [vmem:[#allocation8 + $0x18] sm:$0xff]  ;;  %v254_v36 = vld [vmem:[#allocation8 + $0x20] sm:$0xff]  ;;  %v255_v37 = vld [vmem:[#allocation8 + $0x28] sm:$0xff] }
  0x52   :  { %506 = vmatprep.subr.bf16.mxu1 %v686_v0  ;;  %v528_v35 = vpack.c.bf16 %v253_v34, %v252_v32  ;;  %v531_v38 = vpack.c.bf16 %v255_v37, %v254_v36  ;;  %v256_v39 = vld [vmem:[#allocation8 + $0x30] sm:$0xff]  ;;  %v257_v40 = vld [vmem:[#allocation8 + $0x38] sm:$0xff]  ;;  %v258_v42 = vld [vmem:[#allocation8 + $0x40] sm:$0xff] }
  0x53   :  { %526 = vmatpush3.bf16.msra.mxu0 %v525_v33  ;;  %v534_v41 = vpack.c.bf16 %v257_v40, %v256_v39  ;;  %v259_v43 = vld [vmem:[#allocation8 + $0x48] sm:$0xff]  ;;  %v260_v45 = vld [vmem:[#allocation8 + $0x50] sm:$0xff]  ;;  %v261_v46 = vld [vmem:[#allocation8 + $0x58] sm:$0xff] }
  0x54   :  { %527 = vmatprep.subr.bf16.mxu0 %v686_v0  ;;  %v537_v44 = vpack.c.bf16 %v259_v43, %v258_v42  ;;  %v540_v47 = vpack.c.bf16 %v261_v46, %v260_v45  ;;  %v262_v48 = vld [vmem:[#allocation8 + $0x60] sm:$0xff]  ;;  %v263_v49 = vld [vmem:[#allocation8 + $0x68] sm:$0xff]  ;;  %v264_v56 = vld [vmem:[#allocation8 + $0x70] sm:$0xff] }
  0x55   :  { %508 = vmatpush3.bf16.msra.mxu1 %v507_v14  ;;  %v543_v50 = vpack.c.bf16 %v263_v49, %v262_v48  ;;  %v379_v51 = vld [vmem:[%s830_s4] ss:$0 sm:$0xff]  ;;  %v265_v57 = vld [vmem:[#allocation8 + $0x78] sm:$0xff]  ;;  %v381_v59 = vld [vmem:[%s830_s4 + $0x1] ss:$0 sm:$0xff] }
  0x56   :  { %509 = vmatprep.subr.bf16.mxu1 %v686_v0  ;;  %v546_v58 = vpack.c.bf16 %v265_v57, %v264_v56  ;;  %v382_v2 = vld [vmem:[%s830_s4 + $0x2] ss:$0 sm:$0xff]  ;;  %s689_s4 = smov [#allocation10]  }
  0x57   :  { %529 = vmatpush3.bf16.msra.mxu0 %v528_v35  ;;  %s368_s19 = sshll.u32 %s689_s4, 4  ;;  %s369_s19 = int_to_ptr.vmem [resolvable:$true] %s368_s19 }
  0x58   :  { %530 = vmatprep.subr.bf16.mxu0 %v686_v0  ;;  %s650_s20 = scalar_lea.vmem %s369_s19, 128  ;;  %p655_p5 = scmp.lt.s32.totalorder %s369_s19, %s369_s19 }
  0x59   :  { %511 = vmatpush3.bf16.msra.mxu1 %v510_v17  ;;  %p651_p4 = scmp.ne.s32.totalorder %s369_s19, %s650_s20  ;;  %p656_p6 = scmp.lt.s32.totalorder %s650_s20, %s650_s20 }
  0x5a   :  { %512 = vmatprep.subr.bf16.mxu1 %v686_v0 }
  0x5b   :  { %532 = vmatpush3.bf16.msra.mxu0 %v531_v38  ;;  %p657_p7 = por %p656_p6, %p655_p5 }
  0x5c   :  { %533 = vmatprep.subr.bf16.mxu0 %v686_v0 }
  0x5d   :  { %514 = vmatpush3.bf16.msra.mxu1 %v513_v20  ;;  %p658_p8 = pnand %p657_p7, %p651_p4 }
  0x5e   :  { %515 = vmatprep.subr.bf16.mxu1 %v686_v0 }
  0x5f   :  { %535 = vmatpush3.bf16.msra.mxu0 %v534_v41 }
  0x60   :  { %536 = vmatprep.subr.bf16.mxu0 %v686_v0 }
  0x61   :  { %517 = vmatpush3.bf16.msra.mxu1 %v516_v23 }
  0x62   :  { %518 = vmatprep.subr.bf16.mxu1 %v686_v0 }
  0x63   :  { %538 = vmatpush3.bf16.msra.mxu0 %v537_v44 }
  0x64   :  { %539 = vmatprep.subr.bf16.mxu0 %v686_v0 }
  0x65   :  { %520 = vmatpush3.bf16.msra.mxu1 %v519_v26 }
  0x66   :  { %521 = vmatprep.subr.bf16.mxu1 %v686_v0 }
  0x67   :  { %541 = vmatpush3.bf16.msra.mxu0 %v540_v47 }
  0x68   :  { %542 = vmatprep.subr.bf16.mxu0 %v686_v0 }
  0x69   :  { %523 = vmatpush3.bf16.msra.mxu1 %v522_v29 }
  0x6b   :  { %544 = vmatpush3.bf16.msra.mxu0 %v543_v50 }
  0x6c   :  { %545 = vmatprep.subr.bf16.mxu0 %v686_v0  ;;  %v340_v0 = vlaneseq }
  0x6e   :  { %v341_v1 = vand.u32 127, %v340_v0 }
  0x6f   :  { %547 = vmatpush3.bf16.msra.mxu0 %v546_v58 }
  0x70   :  { %vm345_vm2 = vcmp.ge.s32.totalorder %v341_v1, 8  ;;  %vm346_vm3 = vcmp.lt.s32.totalorder %v341_v1, 12  ;;  %vm342_vm4 = vcmp.lt.s32.totalorder %v341_v1, 4 }
  0x71   :  { %vm806_vm5 = vmand %vm345_vm2, %vm346_vm3 }
 0x123   :  { %v154_v52 = vpop.f32.mrb[0].mxu0 }
 0x124   :  { %v155_v53 = vadd.f32 %v379_v51, %v154_v52  ;;  %v426_v54 = vpop.f32.mrb[1].mxu0 }
 0x126   :  { %v158_v55 = vmax.f32 %v155_v53, 0.0 }
 0x128   :  { %460 = vmatmul.mubr.f32.vlgmr.msra.gmra.mrb[0].mxu1 %v158_v55 }
 0x1fb   :  { %v245_v60 = vpop.f32.mrb[0].mxu1 }
 0x1fc   :  { %v246_v61 = vadd.f32 %v381_v59, %v245_v60  ;;  %v461_v62 = vpop.f32.mrb[1].mxu1 }
 0x1fe   :  { %v249_v63 = vmax.f32 %v246_v61, 0.0 }
 0x200   :  { %495 = vmatmul.mubr.f32.vlgmr.msra.gmra.mrb[2].mxu0 %v249_v63 }
 0x2d3   :  { %v336_v3 = vpop.f32.mrb[2].mxu0 }
 0x2d4   :  { %v337_v4 = vadd.f32 %v382_v2, %v336_v3  ;;  %v496_v5 = vpop.f32.mrb[3].mxu0 }
 0x2d6   :  { %v343_v6 = vmax.f32 %v337_v4, 0.0 }
 0x2d8   :  { %v344_v8 = vsel %vm342_vm4, %v337_v4, %v343_v6 }
 0x2d9   :  { %v348_v9 = vsel %vm806_vm5, %v344_v8, -inf }
 0x2da   :  { %349 = vmax.xlane.f32.xlu0 %v348_v9 }
 0x367   :  { %v350_v10 = vpop.xlane.xlu0 %349 }
 0x368   :  { %v351_v11 = vsub.f32 %v348_v9, %v350_v10 }
 0x36a   :  { %v352_v12 = vmul.f32 1.442695, %v351_v11 }
 0x36c   :  { %558 = vpow2.f32 %v352_v12 }
 0x376   :  { %v559_v13 = vpop.eup %558 }
 0x377   :  { %354 = vadd.xlane.f32.xlu0 %v559_v13 }
 0x404   :  { %v355_v14 = vpop.xlane.xlu0 %354 }
 0x405   :  { %560 = vlog2.f32 %v355_v14 }
 0x40f   :  { %v561_v15 = vpop.eup %560 }
 0x410   :  { %v357_v16 = vmul.f32 0.6931472, %v561_v15 }
 0x412   :  { %v358_v17 = vadd.f32 %v357_v16, %v350_v10 }
 0x414   :  { %v359_v18 = vsub.f32 %v344_v8, %v358_v17 }
 0x416   :  { %v360_v19 = vsel %vm806_vm5, %v359_v18, %v344_v8 }
 0x417   :  { %361 = vst [vmem:[#allocation10] sm:$0xff] %v360_v19 }
 0x418   :  { %661 = shalt.err (!%p658_p8)
}
 0x419   :  { %s662_s23 = scalar_lea.hbm %s831_s5, 128 }
 0x41a   :  { %p663_p9 = scmp.ne.s32.totalorder %s831_s5, %s662_s23  ;;  %p666_p10 = scmp.lt.u32.totalorder %s662_s23, %s831_s5 }
 0x41c   :  { %p668_p11 = pnand %p666_p10, %p663_p9 }
 0x41e   :  { %671 = shalt.err (!%p668_p11)
}
 0x41f   :  { %371 = dma.vmem_to_hbm [thread:$0]  %s369_s19, 128, %s831_s5, [#allocation4]  }
 0x420   :  { %678 = dma.done.wait [#allocation4], 128  }
 0x421   :  { %679 = vsyncadd [#allocation4], 4294967168 }
 0x422   :  { %375 = vsyncpa [#allocation3], 1 }
 0x423   :  { %376 = vsyncpa [#allocation6], 1 }
 0x424   :  { %377 = vsyncpa [#allocation9], 1 }
 0x425   :  { %378 = vsyncpa [#allocation4], 1 }

</bundles_post_ra>
